<compile_context>
chip_gen: v7x
topology: tpu7x:2x2x1
jax: 0.10.0
libtpu: 0.0.40
codegen_flags: <defaults>
</compile_context>

<pallas_src>
import functools

import jax
import jax.numpy as jnp
from jax.experimental import pallas as pl
from jax.experimental.pallas import tpu as pltpu


def _round_up(x, m):
    return -(-x // m) * m


def _pbi_kernel(y_ref, tab_ref, w2_ref, o_ref, *, s_pad, beta, negate, use_mxu):
    """One grid step: TR rows (batch*points or points), all scalarizations.

    y_ref:   (1, TR, M)          objective vectors
    tab_ref: (1, M+2, 2*S_pad)   augmented constant table  [ s-cols | d2-cols ]
    w2_ref:  (1, 1, S_pad)       ||w_j||^2 per flat scalar column
    o_ref:   (1, TR, S_pad)      flattened scalarized values (j = w*R + r)
    """
    sg = -1.0 if negate else 1.0

    y = y_ref[0]          # (TR, M)
    tab = tab_ref[0]      # (M+2, 2*S_pad)
    w2 = w2_ref[0]        # (1, S_pad)
    m = y.shape[-1]

    y2 = jnp.sum(y * y, axis=-1, keepdims=True)            # (TR, 1)

    if use_mxu:
        # Augmented row [y, ||y||^2, 1] -> single MXU contraction gives s and d2.
        xa = jnp.concatenate([y, y2, jnp.ones_like(y2)], axis=-1)       # (TR, M+2)
        sd = jnp.dot(xa, tab, preferred_element_type=jnp.float32)       # (TR, 2*S_pad)
    else:
        # Tiny contraction depth: unrolled, exact-f32 VPU multiply-accumulate.
        sd = y2 * tab[m:m + 1, :] + tab[m + 1:m + 2, :]                 # (TR, 2*S_pad)
        for k in range(m):                                              # static unroll
            sd = sd + y[:, k:k + 1] * tab[k:k + 1, :]

    s = sd[:, :s_pad]          # signed projection w.d                  (TR, S_pad)
    d2 = sd[:, s_pad:]         # ||r - y||^2                            (TR, S_pad)

    conv = jnp.abs(s)
    # diversity^2 = ||d - conv*w||^2 = d2 - 2*conv*s + conv^2*||w||^2 (clamped)
    div2 = d2 + conv * (conv * w2 - (s + s))
    div = jnp.sqrt(jnp.maximum(div2, 0.0))                  # EUP sqrt

    o_ref[0] = sg * conv - beta * div


def _build_tables(weights, ref_points, S, s_pad, sr):
    """Build the augmented constant tables (one-time module-buffer plumbing).

    Returns:
      table: (g0, M+2, 2*s_pad) f32 — columns [0,s_pad) give s, [s_pad,2*s_pad) give d2.
      w2:    (g0, 1, s_pad)      f32 — ||weights[j//R]||^2 per flat column (0 in padding).
    """
    g0, W, M = weights.shape
    R = ref_points.shape[1]
    # Flat per-scalar tables, j = w*R + r (matches torch.flatten(start_dim=-2)).
    wf = jnp.repeat(weights, R, axis=1)          # (g0, S, M): row j -> weights[j // R]
    rf = jnp.tile(ref_points, (1, W, 1))         # (g0, S, M): row j -> ref_points[j % R]
    wr = jnp.sum(wf * rf, axis=-1)               # (g0, S)
    r2 = jnp.sum(rf * rf, axis=-1)               # (g0, S)
    w2 = jnp.sum(wf * wf, axis=-1)               # (g0, S)

    s_cols = jnp.concatenate(
        [-sr * jnp.swapaxes(wf, 1, 2),                    # (g0, M, S)
         jnp.zeros((g0, 1, S), jnp.float32),              # y^2 row unused for s
         (sr * wr)[:, None, :]], axis=1)                  # (g0, M+2, S)
    d_cols = jnp.concatenate(
        [-2.0 * jnp.swapaxes(rf, 1, 2),                   # (g0, M, S)
         jnp.ones((g0, 1, S), jnp.float32),               # picks up ||y||^2
         r2[:, None, :]], axis=1)                         # (g0, M+2, S)

    pad = s_pad - S
    if pad:
        s_cols = jnp.pad(s_cols, ((0, 0), (0, 0), (0, pad)))
        d_cols = jnp.pad(d_cols, ((0, 0), (0, 0), (0, pad)))
        w2 = jnp.pad(w2, ((0, 0), (0, pad)))

    table = jnp.concatenate([s_cols, d_cols], axis=-1)    # (g0, M+2, 2*s_pad)
    return table, w2[:, None, :]


def _choose_row_tile(rows, m, s_pad, n_groups, vmem_budget_bytes=12 << 20):
    """Row-tile TR: large enough to amortize per-step overhead, conservative enough
    for v7x's 64 MiB VMEM, and small enough that the grid has >= 2 parallel steps."""
    # double-buffered Y/out blocks + ~4 S_pad-wide f32 intermediates per row
    per_row = 4 * (2 * m + 2 * s_pad + 4 * 2 * s_pad)
    tr = (vmem_budget_bytes // per_row) // 8 * 8
    tr = max(8, min(tr, _round_up(rows, 8)))
    if n_groups * ((rows + tr - 1) // tr) < 2 and rows > 8:
        tr = _round_up((rows + 1) // 2, 8)      # guarantee >= 2 grid steps (megacore)
    return tr


def pbi_scalarization(Y, weights, ref_points, *, beta=5.0, invert=False, negate=True):
    """Forward pass of PBIScalarization.

    Args:
      Y:          (B, P, M) objective vectors.
      weights:    (W, M) or (B, W, M) weights.
      ref_points: (R, M) or (B, R, M) reference points.

    Returns:
      (B, P, W*R) float32 scalarized values, flattened in (w, r) order.
    """
    Y = jnp.asarray(Y, jnp.float32)
    weights = jnp.asarray(weights, jnp.float32)
    ref_points = jnp.asarray(ref_points, jnp.float32)
    if weights.ndim == 1:
        weights = weights[None]
    if ref_points.ndim == 1:
        ref_points = ref_points[None]

    B, P, M = Y.shape
    shared = (weights.ndim == 2 and ref_points.ndim == 2)

    if shared:
        # Batch-shared tables: fold batch*points into one tall row axis.
        w_b, r_b = weights[None], ref_points[None]
        g0, rows = 1, B * P
        y_rows = Y.reshape(1, rows, M)
    else:
        if weights.ndim == 2:
            weights = jnp.broadcast_to(weights[None], (B,) + weights.shape)
        if ref_points.ndim == 2:
            ref_points = jnp.broadcast_to(ref_points[None], (B,) + ref_points.shape)
        w_b, r_b = weights, ref_points
        g0, rows = B, P
        y_rows = Y

    W, R = w_b.shape[1], r_b.shape[1]
    S = W * R
    S_pad = _round_up(S, 128)                     # lane-dense (unmasked) output stores
    K = M + 2
    sr = -1.0 if invert else 1.0

    table, w2 = _build_tables(w_b, r_b, S, S_pad, sr)

    TR = _choose_row_tile(rows, M, S_pad, g0)
    rows_pad = _round_up(rows, TR)
    if rows_pad != rows:
        y_rows = jnp.pad(y_rows, ((0, 0), (0, rows_pad - rows), (0, 0)))

    grid = (g0, rows_pad // TR)
    use_mxu = K > 8                               # tiny M -> exact VPU MAC, else MXU

    kernel = functools.partial(_pbi_kernel, s_pad=S_pad, beta=float(beta),
                               negate=bool(negate), use_mxu=use_mxu)

    cost = pl.CostEstimate(
        flops=int(g0 * rows_pad * (4 * K * S_pad + 10 * S_pad + 3 * M)),
        transcendentals=int(g0 * rows_pad * S_pad),
        bytes_accessed=int(4 * (g0 * rows_pad * (M + S_pad) + g0 * K * 2 * S_pad + g0 * S_pad)),
    )

    out = pl.pallas_call(
        kernel,
        out_shape=jax.ShapeDtypeStruct((g0, rows_pad, S_pad), jnp.float32),
        grid_spec=pltpu.PrefetchScalarGridSpec(
            num_scalar_prefetch=0,
            grid=grid,
            in_specs=[
                pl.BlockSpec((1, TR, M), lambda b, i: (b, i, 0)),
                pl.BlockSpec((1, K, 2 * S_pad), lambda b, i: (b, 0, 0)),   # grid-resident
                pl.BlockSpec((1, 1, S_pad), lambda b, i: (b, 0, 0)),       # grid-resident
            ],
            out_specs=pl.BlockSpec((1, TR, S_pad), lambda b, i: (b, i, 0)),
        ),
        compiler_params=pltpu.CompilerParams(
            dimension_semantics=("parallel", "parallel"),
            vmem_limit_bytes=32 << 20,
        ),
        cost_estimate=cost,
    )(y_rows, table, w2)

    out = out[:, :rows, :S]                       # drop row / lane padding
    if shared:
        return out.reshape(B, P, S)
    return out


def _pbi_reference(Y, weights, ref_points, *, beta=5.0, invert=False, negate=True):
    """Pure-JAX reference mirroring the PyTorch implementation (direct form)."""
    if weights.ndim == 2:
        weights = jnp.broadcast_to(weights[None], (Y.shape[0],) + weights.shape)
    if ref_points.ndim == 2:
        ref_points = jnp.broadcast_to(ref_points[None], (Y.shape[0],) + ref_points.shape)
    sr = -1.0 if invert else 1.0
    sg = -1.0 if negate else 1.0
    d = sr * (ref_points[:, None, :, :] - Y[:, :, None, :])          # (B, P, R, M)
    diff = d[:, :, None, :, :]                                       # (B, P, 1, R, M)
    ew = weights[:, None, :, None, :]                                # (B, 1, W, 1, M)
    conv = jnp.abs(jnp.sum(ew * diff, axis=-1))                      # (B, P, W, R)
    diversity = jnp.sqrt(jnp.sum((diff - conv[..., None] * ew) ** 2, axis=-1))
    out = sg * conv - beta * diversity
    return out.reshape(out.shape[0], out.shape[1], -1)


if __name__ == "__main__":
    key = jax.random.PRNGKey(0)
    k_y, k_w, k_r = jax.random.split(key, 3)

    B, P, M, W, R = 2, 8, 4, 3, 2   # batch, num_points, num_objectives, num_weights, num_ref

    Y = jax.random.normal(k_y, (B, P, M), dtype=jnp.float32)
    weights = jnp.abs(jax.random.normal(k_w, (W, M), dtype=jnp.float32)) + 0.1
    weights = weights / jnp.sum(weights, axis=-1, keepdims=True)
    ref_points = jax.random.normal(k_r, (R, M), dtype=jnp.float32)

    # Batch-shared (2-D) weights / ref_points: flattened fast path.
    out = pbi_scalarization(Y, weights, ref_points, beta=5.0, invert=False, negate=True)
    out = jax.block_until_ready(out)
    ref = _pbi_reference(Y, weights, ref_points, beta=5.0, invert=False, negate=True)
    assert out.shape == (B, P, W * R), out.shape
    # tolerance covers the (clamped) expanded-norm diversity form
    assert jnp.allclose(out, ref, atol=1e-3, rtol=1e-3), float(jnp.max(jnp.abs(out - ref)))

    # Batched (3-D) weights / ref_points (inverted-PBI settings): per-batch tables.
    weights_b = jnp.stack([weights, weights[::-1]], axis=0)          # (B, W, M)
    ref_b = jnp.stack([ref_points, ref_points + 0.25], axis=0)       # (B, R, M)
    out_b = pbi_scalarization(Y, weights_b, ref_b, beta=5.0, invert=True, negate=False)
    out_b = jax.block_until_ready(out_b)
    ref_b_val = _pbi_reference(Y, weights_b, ref_b, beta=5.0, invert=True, negate=False)
    assert out_b.shape == (B, P, W * R), out_b.shape
    assert jnp.allclose(out_b, ref_b_val, atol=1e-3, rtol=1e-3), \
        float(jnp.max(jnp.abs(out_b - ref_b_val)))

    print("KERNEL_OK")
</pallas_src>

<mosaic_0001>
module attributes {stable_mosaic.version = 11 : i64} {
  func.func @_pbi_kernel(%arg0: i32, %arg1: i32, %arg2: memref<1x8x4xf32, #tpu.memory_space<vmem>>, %arg3: memref<1x6x256xf32, #tpu.memory_space<vmem>>, %arg4: memref<1x1x128xf32, #tpu.memory_space<vmem>>, %arg5: memref<1x8x128xf32, #tpu.memory_space<vmem>>) attributes {dimension_semantics = [#tpu.dimension_semantics<parallel>, #tpu.dimension_semantics<parallel>], iteration_bounds = array<i64: 1, 2>, scalar_prefetch = 0 : i64, scratch_operands = 0 : i64, tpu.core_type = #tpu.core_type<tc>, window_params = [{transform_indices = @transform_0, window_bounds = array<i64: 1, 8, 4>}, {transform_indices = @transform_1, window_bounds = array<i64: 1, 6, 256>}, {transform_indices = @transform_2, window_bounds = array<i64: 1, 1, 128>}, {transform_indices = @transform_3, window_bounds = array<i64: 1, 8, 128>}]} {
    %c0 = arith.constant 0 : index
    %c0_0 = arith.constant 0 : index
    %c0_1 = arith.constant 0 : index
    %0 = vector.load %arg2[%c0, %c0_0, %c0_1] : memref<1x8x4xf32, #tpu.memory_space<vmem>>, vector<1x8x4xf32>
    %1 = vector.shape_cast %0 : vector<1x8x4xf32> to vector<8x4xf32>
    %c0_2 = arith.constant 0 : index
    %c0_3 = arith.constant 0 : index
    %c0_4 = arith.constant 0 : index
    %2 = vector.load %arg3[%c0_2, %c0_3, %c0_4] : memref<1x6x256xf32, #tpu.memory_space<vmem>>, vector<1x6x256xf32>
    %3 = vector.shape_cast %2 : vector<1x6x256xf32> to vector<6x256xf32>
    %c0_5 = arith.constant 0 : index
    %c0_6 = arith.constant 0 : index
    %c0_7 = arith.constant 0 : index
    %4 = vector.load %arg4[%c0_5, %c0_6, %c0_7] : memref<1x1x128xf32, #tpu.memory_space<vmem>>, vector<1x1x128xf32>
    %5 = vector.shape_cast %4 : vector<1x1x128xf32> to vector<1x128xf32>
    %6 = arith.mulf %1, %1 : vector<8x4xf32>
    %cst = arith.constant dense<0.000000e+00> : vector<8xf32>
    %7 = vector.multi_reduction <add>, %6, %cst [1] : vector<8x4xf32> to vector<8xf32>
    %8 = vector.shape_cast %7 : vector<8xf32> to vector<8x1xf32>
    %9 = vector.extract_strided_slice %3 {offsets = [4, 0], sizes = [1, 256], strides = [1, 1]} : vector<6x256xf32> to vector<1x256xf32>
    %10 = vector.broadcast %8 : vector<8x1xf32> to vector<8x256xf32>
    %11 = vector.broadcast %9 : vector<1x256xf32> to vector<8x256xf32>
    %12 = arith.mulf %10, %11 : vector<8x256xf32>
    %13 = vector.extract_strided_slice %3 {offsets = [5, 0], sizes = [1, 256], strides = [1, 1]} : vector<6x256xf32> to vector<1x256xf32>
    %14 = vector.broadcast %13 : vector<1x256xf32> to vector<8x256xf32>
    %15 = arith.addf %12, %14 : vector<8x256xf32>
    %16 = vector.extract_strided_slice %1 {offsets = [0, 0], sizes = [8, 1], strides = [1, 1]} : vector<8x4xf32> to vector<8x1xf32>
    %17 = vector.extract_strided_slice %3 {offsets = [0, 0], sizes = [1, 256], strides = [1, 1]} : vector<6x256xf32> to vector<1x256xf32>
    %18 = vector.broadcast %16 : vector<8x1xf32> to vector<8x256xf32>
    %19 = vector.broadcast %17 : vector<1x256xf32> to vector<8x256xf32>
    %20 = arith.mulf %18, %19 : vector<8x256xf32>
    %21 = arith.addf %15, %20 : vector<8x256xf32>
    %22 = vector.extract_strided_slice %1 {offsets = [0, 1], sizes = [8, 1], strides = [1, 1]} : vector<8x4xf32> to vector<8x1xf32>
    %23 = vector.extract_strided_slice %3 {offsets = [1, 0], sizes = [1, 256], strides = [1, 1]} : vector<6x256xf32> to vector<1x256xf32>
    %24 = vector.broadcast %22 : vector<8x1xf32> to vector<8x256xf32>
    %25 = vector.broadcast %23 : vector<1x256xf32> to vector<8x256xf32>
    %26 = arith.mulf %24, %25 : vector<8x256xf32>
    %27 = arith.addf %21, %26 : vector<8x256xf32>
    %28 = vector.extract_strided_slice %1 {offsets = [0, 2], sizes = [8, 1], strides = [1, 1]} : vector<8x4xf32> to vector<8x1xf32>
    %29 = vector.extract_strided_slice %3 {offsets = [2, 0], sizes = [1, 256], strides = [1, 1]} : vector<6x256xf32> to vector<1x256xf32>
    %30 = vector.broadcast %28 : vector<8x1xf32> to vector<8x256xf32>
    %31 = vector.broadcast %29 : vector<1x256xf32> to vector<8x256xf32>
    %32 = arith.mulf %30, %31 : vector<8x256xf32>
    %33 = arith.addf %27, %32 : vector<8x256xf32>
    %34 = vector.extract_strided_slice %1 {offsets = [0, 3], sizes = [8, 1], strides = [1, 1]} : vector<8x4xf32> to vector<8x1xf32>
    %35 = vector.extract_strided_slice %3 {offsets = [3, 0], sizes = [1, 256], strides = [1, 1]} : vector<6x256xf32> to vector<1x256xf32>
    %36 = vector.broadcast %34 : vector<8x1xf32> to vector<8x256xf32>
    %37 = vector.broadcast %35 : vector<1x256xf32> to vector<8x256xf32>
    %38 = arith.mulf %36, %37 : vector<8x256xf32>
    %39 = arith.addf %33, %38 : vector<8x256xf32>
    %40 = vector.extract_strided_slice %39 {offsets = [0, 0], sizes = [8, 128], strides = [1, 1]} : vector<8x256xf32> to vector<8x128xf32>
    %41 = vector.extract_strided_slice %39 {offsets = [0, 128], sizes = [8, 128], strides = [1, 1]} : vector<8x256xf32> to vector<8x128xf32>
    %42 = math.absf %40 : vector<8x128xf32>
    %43 = vector.broadcast %5 : vector<1x128xf32> to vector<8x128xf32>
    %44 = arith.mulf %42, %43 : vector<8x128xf32>
    %45 = arith.addf %40, %40 : vector<8x128xf32>
    %46 = arith.subf %44, %45 : vector<8x128xf32>
    %47 = arith.mulf %42, %46 : vector<8x128xf32>
    %48 = arith.addf %41, %47 : vector<8x128xf32>
    %cst_8 = arith.constant 0.000000e+00 : f32
    %49 = vector.broadcast %cst_8 : f32 to vector<8x128xf32>
    %50 = arith.maximumf %48, %49 : vector<8x128xf32>
    %51 = math.sqrt %50 : vector<8x128xf32>
    %cst_9 = arith.constant -1.000000e+00 : f32
    %52 = vector.broadcast %cst_9 : f32 to vector<8x128xf32>
    %53 = arith.mulf %52, %42 : vector<8x128xf32>
    %cst_10 = arith.constant 5.000000e+00 : f32
    %54 = vector.broadcast %cst_10 : f32 to vector<8x128xf32>
    %55 = arith.mulf %54, %51 : vector<8x128xf32>
    %56 = arith.subf %53, %55 : vector<8x128xf32>
    %c0_11 = arith.constant 0 : index
    %c0_12 = arith.constant 0 : index
    %c0_13 = arith.constant 0 : index
    %57 = vector.load %arg5[%c0_11, %c0_12, %c0_13] : memref<1x8x128xf32, #tpu.memory_space<vmem>>, vector<1x8x128xf32>
    %58 = vector.shape_cast %57 : vector<1x8x128xf32> to vector<8x128xf32>
    %59 = vector.shape_cast %56 : vector<8x128xf32> to vector<1x8x128xf32>
    tpu.vector_store %arg5[%c0_11, %c0_12, %c0_13], %59 {strides = array<i32>} : memref<1x8x128xf32, #tpu.memory_space<vmem>>, vector<1x8x128xf32>,
    return
  }
  func.func @transform_0(%arg0: i32, %arg1: i32) -> (i32, i32, i32) {
    %c0_i32 = arith.constant 0 : i32
    %c0_i32_0 = arith.constant 0 : i32
    return %arg0, %arg1, %c0_i32 : i32, i32, i32
  }
  func.func @transform_1(%arg0: i32, %arg1: i32) -> (i32, i32, i32) {
    %c0_i32 = arith.constant 0 : i32
    %c0_i32_0 = arith.constant 0 : i32
    %c0_i32_1 = arith.constant 0 : i32
    return %arg0, %c0_i32, %c0_i32_0 : i32, i32, i32
  }
  func.func @transform_2(%arg0: i32, %arg1: i32) -> (i32, i32, i32) {
    %c0_i32 = arith.constant 0 : i32
    %c0_i32_0 = arith.constant 0 : i32
    %c0_i32_1 = arith.constant 0 : i32
    return %arg0, %c0_i32, %c0_i32_0 : i32, i32, i32
  }
  func.func @transform_3(%arg0: i32, %arg1: i32) -> (i32, i32, i32) {
    %c0_i32 = arith.constant 0 : i32
    %c0_i32_0 = arith.constant 0 : i32
    return %arg0, %arg1, %c0_i32 : i32, i32, i32
  }
}

</mosaic_0001>

<bundles_post_ra>
// kernel: tpu_custom_call.1
= control target key start
LH: loop header
LB: loop body
LE: loop exit
PB: predicated region body
PF: predicated region fallthrough
CT: control target
= control target key end

     0   :  { %8 = vsyncpa [#allocation3], 0  ;;  %s770_s0 = inlined_call_operand.vmem [shape: f32[1,16,4], index: 0, kind: input, shape index: {}]   ;;  %s771_s1 = inlined_call_operand.vmem [shape: f32[1,6,256], index: 1, kind: input, shape index: {}]   ;;  %s772_s2 = inlined_call_operand.vmem [shape: f32[1,1,128], index: 2, kind: input, shape index: {}]   ;;  %s773_s3 = inlined_call_operand.hbm [shape: f32[1,16,128], index: 3, kind: output, shape index: {}]  }
   0x1   :  { %10 = vsyncpa [#allocation3 + $0x1], 0  ;;  %s649_s12 = smov 0   ;;  %s651_s13 = smov 0  }
   0x2   :  { %s653_s14 = smov 0   ;;  %s655_s15 = smov 0  }
   0x3   :  { %s657_s16 = smov 0   ;;  %s659_s17 = smov 0  }
   0x4 LB: > { %s464_s18 = sadd.s32 4294967295, %s622_s17   ;;  %s465_s19 = sadd.s32 4294967294, %s622_s17   ;;  %s622_s17 = sphi %s659_s17, %s16_s17   ;;  %s618_s16 = sphi %s657_s16, %s780_s16   ;;  %s614_s15 = sphi %s655_s15, %s779_s15   ;;  %s610_s14 = sphi %s653_s14, %s778_s14   ;;  %s606_s13 = sphi %s651_s13, %s777_s13   ;;  %s602_s12 = sphi %s649_s12, %s776_s12  }
   0x5   : > { %s25_s20 = sadd.s32 1, %s618_s16  ;;  %s117_s21 = sadd.s32 1, %s610_s14 }
   0x6   : > { %p26_p0 = scmp.ge.s32.totalorder %s25_s20, 2  ;;  %p127_p1 = scmp.ne.s32.totalorder %s610_s14, %s606_s13 }
   0x7   : > { %p128_p2 = scmp.eq.s32.totalorder %s464_s18, 1  ;;  %p133_p3 = scmp.ne.s32.totalorder %s606_s13, %s602_s12 }
   0x8   : > { %s782_s20 = smov (%p26_p0, %s25_s20), 0  ;;  %p134_p5 = scmp.eq.s32.totalorder %s465_s19, 1 }
   0x9   : > { %p689_p4 = por %p128_p2, %p127_p1  ;;  %s113_s23 = ssub.s32 %s618_s16, %s782_s20 }
   0xa   : > { %p470_p6 = scmp.ge.s32.totalorder %s622_s17, 1  ;;  %p115_p7 = scmp.eq.s32.totalorder %s113_s23, 0 }
   0xb   : > { %p696_p8 = por %p134_p5, %p133_p3  ;;  %p177_p9 = scmp.lt.s32.totalorder %s622_s17, 3 }
   0xc   : > { %s702_s25 = scalar_select %p115_p7, %s610_s14, %s117_s21  }
   0xd   : > { %p178_p10 = pnand %p470_p6, %p177_p9 }
   0xe   : > { %p214_p11 = scmp.lt.s32.totalorder (!%p178_p10), %s614_s15, 1  ;;  %v624_v0 = vmov (!%p178_p10), 1   ;;  %v625_v1 = vmov (!%p178_p10), 0   ;;  %vm233_vm0 = vcmask (!%p178_p10), 31744   ;;  %v626_v5 = vmov (!%p178_p10), 2   ;;  %s209_s10 = sand.u32 (!%p178_p10), 1, %s606_s13  }
   0xf   : > { %181 = sbr.rel (%p178_p10) target bundleno = 235 (0xeb), region = 32  ;;  %538 = vset.pattern.permute.xlu1 (!%p178_p10), %v624_v0  ;;  %537 = vset.pattern.permute.xlu0 (!%p178_p10), %v625_v1  ;;  %v627_v6 = vmov (!%p178_p10), 3   ;;  %v237_v7 = vlaneseq (!%p178_p10)  ;;  %v229_v10 = vld [vmem:[%s771_s1] sm:$0x3f] (!%p178_p10)  ;;  %v230_v12 = vld [vmem:[%s771_s1 + $0x8] sm:$0x3f] (!%p178_p10) }
  0x10   : > { %v473_v50 = vld [vmem:[%s772_s2] ss:$0 sm:$0xff] (!%p178_p10)  ;;  %s471_s11 = sshll.u32 (!%p178_p10), %s209_s10, 3  ;;  %s475_s18 = sshll.u32 (!%p178_p10), %s614_s15, 7 }
  0x11   : > { %v238_v8 = vshrl.u32 (!%p178_p10), %v237_v7, 7  ;;  %s211_s19 = scalar_lea.vmem (!%p178_p10), [#allocation2], %s471_s11  ;;  %s347_s28 = scalar_lea.sflag (!%p178_p10), [#allocation3], %s209_s10 }
  0x12   : > { %s362_s21 = sshll.u32 (!%p178_p10), %s211_s19, 4  ;;  %s725_s21 = int_to_ptr.vmem [resolvable:$true] %s362_s21 }
  0x13   : > { %v239_v9 = vsub.s32 (!%p178_p10), 4, %v238_v8  ;;  %v249_v13 = vsub.s32 (!%p178_p10), 5, %v238_v8  ;;  %v264_v15 = vsub.s32 (!%p178_p10), 0, %v238_v8  ;;  %v280_v18 = vsub.s32 (!%p178_p10), 1, %v238_v8  ;;  %s544_s29 = scalar_lea.vmem (!%p178_p10), %s725_s21, 128 }
  0x14   : > { %v296_v20 = vsub.s32 (!%p178_p10), 2, %v238_v8  ;;  %v312_v25 = vsub.s32 (!%p178_p10), 3, %v238_v8  ;;  %p545_p12 = scmp.ne.s32.totalorder (!%p178_p10), %s725_s21, %s544_s29 }
  0x15   : > { %v240_v14 = vrot.slane (!%p178_p10), %v229_v10, %v239_v9  ;;  %v244_v17 = vrot.slane (!%p178_p10), %v230_v12, %v239_v9  ;;  %v250_v19 = vrot.slane (!%p178_p10), %v229_v10, %v249_v13  ;;  %v265_v23 = vrot.slane (!%p178_p10), %v229_v10, %v264_v15 }
  0x16   : > { %s215_s26 = scalar_select %p214_p11, %s614_s15, 1  ;;  %v269_v24 = vrot.slane %v230_v12, %v264_v15  ;;  %v254_v26 = vrot.slane %v230_v12, %v249_v13  ;;  %v281_v28 = vrot.slane %v229_v10, %v280_v18  ;;  %v297_v30 = vrot.slane %v229_v10, %v296_v20 }
  0x17   : > { %v313_v34 = vrot.slane %v229_v10, %v312_v25  ;;  %v285_v37 = vrot.slane %v230_v12, %v280_v18  ;;  %v301_v45 = vrot.slane %v230_v12, %v296_v20  ;;  %v317_v48 = vrot.slane %v230_v12, %v312_v25  ;;  %p546_p13 = pnand %p545_p12, %p689_p4  ;;  %s628_s15 = smov [#allocation2]  }
  0x18   : > { %s472_s27 = sshll.u32 %s215_s26, 3 }
  0x19   : > { %s219_s30 = scalar_lea.vmem %s770_s0, %s472_s27  ;;  %s723_s27 = scalar_lea.hbm %s773_s3, %s475_s18 }
  0x1a   : > { %v228_v2 = vld [vmem:[%s219_s30] sm:$0xff]  ;;  %p547_p0 = pneg %p546_p13  ;;  %s548_s30 = sshll.u32 %s628_s15, 4  ;;  %s549_s30 = int_to_ptr.vmem [resolvable:$false] %s548_s30 }
  0x1b   : > { %v232_v3 = vmul.f32 %v228_v2, %v228_v2  ;;  %275 = vperm.xlu1 %538, %v228_v2   ;;  %s550_s4 = scalar_lea.vmem %s549_s30, 256  ;;  %p551_p1 = scmp.lt.s32.totalorder %s725_s21, %s549_s30 }
  0x1c   : > { %p552_p2 = scmp.lt.s32.totalorder %s550_s4, %s544_s29 }
  0x1d   : > { %v234_v4 = vsel %vm233_vm0, %v232_v3, 0.0 }
  0x1e   : > { %235 = vadd.xlane.f32.xlu0 %v234_v4  ;;  %p553_p3 = por %p552_p2, %p551_p1 }
  0x1f   : > { %539 = vset.pattern.permute.xlu1 %v626_v5 }
  0x20   : > { %291 = vperm.xlu1 %539, %v228_v2   ;;  %p554_p5 = pnand %p553_p3, %p547_p0 }
  0x24   : > { %540 = vset.pattern.permute.xlu1 %v627_v6 }
  0x25   : > { %307 = vperm.xlu1 %540, %v228_v2  }
  0x34   : > { %259 = vperm.xlu0 %537, %v228_v2  }
  0x38   : > { %541 = vset.pattern.permute.xlu0 %v627_v6 }
  0x9a   : > { %v276_v11 = vpop.permute.xlu1 %275 }
  0x9b   : > { %v286_v38 = vmul.f32 %v281_v28, %v276_v11  ;;  %v287_v44 = vmul.f32 %v285_v37, %v276_v11 }
  0x9f   : > { %v292_v21 = vpop.permute.xlu1 %291 }
  0xa0   : > { %v302_v42 = vmul.f32 %v297_v30, %v292_v21  ;;  %v303_v51 = vmul.f32 %v301_v45, %v292_v21 }
  0xa4   : > { %v308_v35 = vpop.permute.xlu1 %307 }
  0xa5   : > { %v318_v43 = vmul.f32 %v313_v34, %v308_v35  ;;  %v319_v54 = vmul.f32 %v317_v48, %v308_v35 }
  0xab   : > { %v236_v16 = vpop.xlane.xlu0 %235 }
  0xac   : > { %v245_v22 = vmul.f32 %v240_v14, %v236_v16  ;;  %v246_v27 = vmul.f32 %v244_v17, %v236_v16 }
  0xae   : > { %v255_v31 = vadd.f32 %v250_v19, %v245_v22  ;;  %v256_v36 = vadd.f32 %v254_v26, %v246_v27 }
  0xb3   : > { %v260_v29 = vpop.permute.xlu0 %259 }
  0xb4   : > { %v270_v32 = vmul.f32 %v265_v23, %v260_v29  ;;  %v271_v33 = vmul.f32 %v269_v24, %v260_v29 }
  0xb6   : > { %v272_v39 = vadd.f32 %v270_v32, %v255_v31  ;;  %v273_v40 = vadd.f32 %v271_v33, %v256_v36 }
  0xb8   : > { %v288_v41 = vadd.f32 %v286_v38, %v272_v39  ;;  %v289_v47 = vadd.f32 %v287_v44, %v273_v40 }
  0xba   : > { %v304_v46 = vadd.f32 %v302_v42, %v288_v41  ;;  %v305_v53 = vadd.f32 %v303_v51, %v289_v47 }
  0xbc   : > { %v320_v49 = vadd.f32 %v318_v43, %v304_v46  ;;  %v321_v58 = vadd.f32 %v319_v54, %v305_v53 }
  0xbe   : > { %v322_v52 = vand.u32 2147483647, %v320_v49  ;;  %v330_v56 = vadd.f32 %v320_v49, %v320_v49 }
  0xc0   : > { %v329_v55 = vmul.f32 %v473_v50, %v322_v52  ;;  %v342_v3 = vmul.f32 -1.0, %v322_v52 }
  0xc2   : > { %v331_v57 = vsub.f32 %v329_v55, %v330_v56 }
  0xc4   : > { %v332_v59 = vmul.f32 %v331_v57, %v322_v52 }
  0xc6   : > { %v333_v60 = vadd.f32 %v332_v59, %v321_v58 }
  0xc8   : > { %v334_v61 = vmax.f32 %v333_v60, 0.0 }
  0xca   : > { %542 = vrsqrt.f32 %v334_v61  ;;  %vm337_vm1 = vcmp.eq.f32.partialorder %v334_v61, inf  ;;  %v340_v0 = vand.u32 2147483648, %v334_v61  ;;  %vm339_vm2 = vcmp.eq.f32.partialorder %v334_v61, 0.0 }
  0xd4   : > { %v543_v62 = vpop.eup %542 }
  0xd5   : > { %v336_v63 = vmul.f32 %v543_v62, %v334_v61 }
  0xd7   : > { %v338_v1 = vsel %vm337_vm1, %v334_v61, %v336_v63 }
  0xd8   : > { %v341_v2 = vsel %vm339_vm2, %v340_v0, %v338_v1 }
  0xd9   : > { %v343_v4 = vmul.f32 5.0, %v341_v2 }
  0xdb   : > { %v344_v5 = vsub.f32 %v342_v3, %v343_v4 }
  0xdd   : > { %345 = vst [vmem:[%s211_s19] sm:$0xff] %v344_v5 }
  0xde   : > { %557 = shalt.err (!%p554_p5)
}
  0xdf   : > { %s558_s5 = scalar_lea.hbm %s723_s27, 128  ;;  %s562_s8 = scalar_lea.hbm %s773_s3, 256 }
  0xe0   : > { %p559_p6 = scmp.ne.s32.totalorder %s723_s27, %s558_s5  ;;  %p563_p10 = scmp.lt.u32.totalorder %s723_s27, %s773_s3 }
  0xe1   : > { %p564_p11 = scmp.lt.u32.totalorder %s562_s8, %s558_s5  ;;  %p566_p13 = scmp.lt.u32.totalorder %s558_s5, %s723_s27 }
  0xe2   : > { %p560_p7 = pnand %p559_p6, %p689_p4 }
  0xe3   : > { %p565_p12 = por %p564_p11, %p563_p10 }
  0xe4   : > { %p561_p9 = pneg %p560_p7 }
  0xe5   : > { %p567_p0 = por %p566_p13, %p565_p12 }
  0xe7   : > { %p568_p1 = pnand %p567_p0, %p561_p9 }
  0xe9   : > { %571 = shalt.err (!%p568_p1)
}
  0xea   : > { %478 = dma.vmem_to_hbm [thread:$0]  (%p689_p4), %s725_s21, 128, %s723_s27, %s347_s28  }
  0xeb PF: > { %p484_p2 = scmp.ge.s32.totalorder %s622_s17, 2  ;;  %s374_s11 = sand.u32 1, %s602_s12  }
  0xec   : > { %s375_s18 = scalar_lea.sflag [#allocation3], %s374_s11 }
  0xed   : > { %p481_p3 = pnand %p484_p2, %p696_p8 }
  0xef   : > { %597 = dma.done.wait (!%p481_p3), %s375_s18, 128  }
  0xf0   : > { %599 = vsyncadd (!%p481_p3), %s375_s18, 4294967168  ;;  %s16_s17 = sadd.s32 1, %s622_s17   ;;  %s776_s12 = smov %s606_s13 }
  0xf1   : > { %p13_p5 = scmp.ge.s32.totalorder %s16_s17, 4   ;;  %s777_s13 = smov %s610_s14 }
  0xf2   : > { %s778_s14 = smov %s702_s25  ;;  %s779_s15 = smov %s618_s16 }
  0xf3   : > { %s780_s16 = smov %s782_s20  ;;  %15 = sbr.rel (!%p13_p5) target bundleno = 4 (0x4), region = 73 }
  0xfa   :  { %380 = vsyncpa [#allocation3], 1 }
  0xfb   :  { %382 = vsyncpa [#allocation3 + $0x1], 1 }

</bundles_post_ra>
